<compile_context>
chip_gen: v7x
topology: tpu7x:2x2x1
jax: 0.10.0
libtpu: 0.0.40
codegen_flags: <defaults>
</compile_context>

<pallas_src>
import jax
import jax.numpy as jnp
from jax.experimental import pallas as pl
from jax.experimental.pallas import tpu as pltpu

_VPU_CHANNEL_THRESHOLD = 16


def _residual_conv1x1_kernel(x_ref, w_ref, b_ref, o_ref):
    # x_ref: (C, TM) channel-major activation tile (lanes = spatial positions)
    # w_ref: (C_out, C_in) full 1x1-conv weight
    # b_ref: (C, 1) f32 bias
    x = x_ref[...]
    w = w_ref[...]
    b = b_ref[...]
    c = x.shape[0]
    if c <= _VPU_CHANNEL_THRESHOLD:
        # A (C,C)x(C,TM) matmul at C=4 would occupy <1% of the MXU and still
        # pay push/pop latency -> do C broadcast multiply-adds on the VPU,
        # fused with bias + residual, all in f32.
        xf = x.astype(jnp.float32)
        wf = w.astype(jnp.float32)
        acc = b + xf  # bias + residual, broadcast to (C, TM)
        for ci in range(c):  # static unroll; C is tiny
            acc = acc + wf[:, ci:ci + 1] * xf[ci:ci + 1, :]
        o_ref[...] = acc.astype(o_ref.dtype)
    else:
        # Realistic C (>= 128): MXU matmul with f32 accumulation.
        y = jnp.dot(w, x, preferred_element_type=jnp.float32)
        o_ref[...] = (y + b + x.astype(jnp.float32)).astype(o_ref.dtype)


def _pick_tile(hw, target=1024):
    """Largest spatial tile <= target dividing hw; prefers multiples of 128."""
    if hw <= target:
        return hw
    for tm in range(target - target % 128, 0, -128):
        if hw % tm == 0:
            return tm
    # TODO(synk): pad H*W to a multiple of 128 for ragged spatial sizes.
    for tm in range(target, 0, -1):
        if hw % tm == 0:
            return tm
    return hw


def residual_conv1x1(x_nchw, weight, bias, *, tm_target=1024):
    """Residual(Conv2d(C, C, 1)) forward: fn(x) + x. NCHW in / NCHW out.

    x_nchw: (N, C, H, W)
    weight: (C_out, C_in, 1, 1)  -- PyTorch Conv2d layout
    bias:   (C_out,)
    """
    n, c, h, w = x_nchw.shape
    hw = h * w
    tm = _pick_tile(hw, tm_target)

    # (N, C, H, W) -> (N, C, H*W): pure reshape, no data movement.
    x3 = x_nchw.reshape(n, c, hw)

    # Conv2d(C,C,1): y[co, m] = sum_ci W[co, ci] * x[ci, m] + b[co]
    w2 = weight[:, :, 0, 0].astype(x_nchw.dtype)   # (C_out, C_in), no transpose
    b2 = bias.reshape(c, 1).astype(jnp.float32)    # (C, 1) f32

    # Explicit VMEM budget: double-buffered x & out tiles + weight + bias,
    # with headroom, capped well below v7x's 64 MiB physical VMEM.
    elem = jnp.dtype(x_nchw.dtype).itemsize
    need = 2 * (2 * c * tm * elem)           # x + out tiles, double-buffered
    need += 2 * c * c * elem + 2 * c * 4     # weight (double-buffered) + bias
    vmem_limit = int(min(max(4 * need + (1 << 20), 16 << 20), 48 << 20))

    out3 = pl.pallas_call(
        _residual_conv1x1_kernel,
        out_shape=jax.ShapeDtypeStruct((n, c, hw), x_nchw.dtype),
        grid_spec=pltpu.PrefetchScalarGridSpec(
            num_scalar_prefetch=0,
            grid=(n, hw // tm),
            in_specs=[
                # batch dim squeezed out of the kernel view -> (C, TM)
                pl.BlockSpec((None, c, tm), lambda b, i: (b, 0, i)),
                pl.BlockSpec((c, c), lambda b, i: (0, 0)),   # full weight
                pl.BlockSpec((c, 1), lambda b, i: (0, 0)),   # bias
            ],
            out_specs=pl.BlockSpec((None, c, tm), lambda b, i: (b, 0, i)),
        ),
        compiler_params=pltpu.CompilerParams(
            dimension_semantics=("parallel", "parallel"),
            vmem_limit_bytes=vmem_limit,
        ),
    )(x3, w2, b2)

    # (N, C, H*W) -> (N, C, H, W): pure reshape.
    return out3.reshape(n, c, h, w)


if __name__ == "__main__":
    key = jax.random.PRNGKey(0)
    kx, kw, kb = jax.random.split(key, 3)

    N, C, H, W = 2, 4, 16, 16
    x = jax.random.normal(kx, (N, C, H, W), dtype=jnp.float32)

    # Deterministic synthetic parameters for fn = Conv2d(C, C, kernel_size=1)
    fan_in = C  # C_in * 1 * 1
    bound = 1.0 / (fan_in ** 0.5)
    weight = jax.random.uniform(kw, (C, C, 1, 1), minval=-bound, maxval=bound,
                                dtype=jnp.float32)
    bias = jax.random.uniform(kb, (C,), minval=-bound, maxval=bound,
                              dtype=jnp.float32)

    out = residual_conv1x1(x, weight, bias)
    out = jax.block_until_ready(out)

    # Pure-JAX reference: fn(x) + x with fn = 1x1 conv (NCHW).
    ref = (jnp.einsum("nchw,oc->nohw", x, weight[:, :, 0, 0])
           + bias[None, :, None, None] + x)
    assert out.shape == (N, C, H, W)
    assert jnp.allclose(out, ref, atol=1e-5, rtol=1e-5)

    print("KERNEL_OK")
</pallas_src>

<mosaic_0001>
module attributes {stable_mosaic.version = 11 : i64} {
  func.func @_residual_conv1x1_kernel(%arg0: i32, %arg1: i32, %arg2: memref<1x4x256xf32, #tpu.memory_space<vmem>>, %arg3: memref<4x4xf32, #tpu.memory_space<vmem>>, %arg4: memref<4x1xf32, #tpu.memory_space<vmem>>, %arg5: memref<1x4x256xf32, #tpu.memory_space<vmem>>) attributes {dimension_semantics = [#tpu.dimension_semantics<parallel>, #tpu.dimension_semantics<parallel>], iteration_bounds = array<i64: 2, 1>, scalar_prefetch = 0 : i64, scratch_operands = 0 : i64, tpu.core_type = #tpu.core_type<tc>, window_params = [{transform_indices = @transform_0, window_bounds = array<i64: 1, 4, 256>}, {pipeline_mode = #tpu.pipeline_mode<synchronous>, transform_indices = @transform_1, window_bounds = array<i64: 4, 4>}, {pipeline_mode = #tpu.pipeline_mode<synchronous>, transform_indices = @transform_2, window_bounds = array<i64: 4, 1>}, {transform_indices = @transform_3, window_bounds = array<i64: 1, 4, 256>}]} {
    %c0 = arith.constant 0 : index
    %c0_0 = arith.constant 0 : index
    %c0_1 = arith.constant 0 : index
    %0 = vector.load %arg2[%c0, %c0_0, %c0_1] : memref<1x4x256xf32, #tpu.memory_space<vmem>>, vector<1x4x256xf32>
    %1 = vector.shape_cast %0 : vector<1x4x256xf32> to vector<4x256xf32>
    %c0_2 = arith.constant 0 : index
    %c0_3 = arith.constant 0 : index
    %2 = vector.load %arg3[%c0_2, %c0_3] : memref<4x4xf32, #tpu.memory_space<vmem>>, vector<4x4xf32>
    %c0_4 = arith.constant 0 : index
    %c0_5 = arith.constant 0 : index
    %3 = vector.load %arg4[%c0_4, %c0_5] : memref<4x1xf32, #tpu.memory_space<vmem>>, vector<4x1xf32>
    %4 = vector.broadcast %3 : vector<4x1xf32> to vector<4x256xf32>
    %5 = arith.addf %4, %1 : vector<4x256xf32>
    %6 = vector.extract_strided_slice %2 {offsets = [0, 0], sizes = [4, 1], strides = [1, 1]} : vector<4x4xf32> to vector<4x1xf32>
    %7 = vector.extract_strided_slice %1 {offsets = [0, 0], sizes = [1, 256], strides = [1, 1]} : vector<4x256xf32> to vector<1x256xf32>
    %8 = vector.broadcast %6 : vector<4x1xf32> to vector<4x256xf32>
    %9 = vector.broadcast %7 : vector<1x256xf32> to vector<4x256xf32>
    %10 = arith.mulf %8, %9 : vector<4x256xf32>
    %11 = arith.addf %5, %10 : vector<4x256xf32>
    %12 = vector.extract_strided_slice %2 {offsets = [0, 1], sizes = [4, 1], strides = [1, 1]} : vector<4x4xf32> to vector<4x1xf32>
    %13 = vector.extract_strided_slice %1 {offsets = [1, 0], sizes = [1, 256], strides = [1, 1]} : vector<4x256xf32> to vector<1x256xf32>
    %14 = vector.broadcast %12 : vector<4x1xf32> to vector<4x256xf32>
    %15 = vector.broadcast %13 : vector<1x256xf32> to vector<4x256xf32>
    %16 = arith.mulf %14, %15 : vector<4x256xf32>
    %17 = arith.addf %11, %16 : vector<4x256xf32>
    %18 = vector.extract_strided_slice %2 {offsets = [0, 2], sizes = [4, 1], strides = [1, 1]} : vector<4x4xf32> to vector<4x1xf32>
    %19 = vector.extract_strided_slice %1 {offsets = [2, 0], sizes = [1, 256], strides = [1, 1]} : vector<4x256xf32> to vector<1x256xf32>
    %20 = vector.broadcast %18 : vector<4x1xf32> to vector<4x256xf32>
    %21 = vector.broadcast %19 : vector<1x256xf32> to vector<4x256xf32>
    %22 = arith.mulf %20, %21 : vector<4x256xf32>
    %23 = arith.addf %17, %22 : vector<4x256xf32>
    %24 = vector.extract_strided_slice %2 {offsets = [0, 3], sizes = [4, 1], strides = [1, 1]} : vector<4x4xf32> to vector<4x1xf32>
    %25 = vector.extract_strided_slice %1 {offsets = [3, 0], sizes = [1, 256], strides = [1, 1]} : vector<4x256xf32> to vector<1x256xf32>
    %26 = vector.broadcast %24 : vector<4x1xf32> to vector<4x256xf32>
    %27 = vector.broadcast %25 : vector<1x256xf32> to vector<4x256xf32>
    %28 = arith.mulf %26, %27 : vector<4x256xf32>
    %29 = arith.addf %23, %28 : vector<4x256xf32>
    %c0_6 = arith.constant 0 : index
    %c0_7 = arith.constant 0 : index
    %c0_8 = arith.constant 0 : index
    %30 = vector.load %arg5[%c0_6, %c0_7, %c0_8] : memref<1x4x256xf32, #tpu.memory_space<vmem>>, vector<1x4x256xf32>
    %31 = vector.shape_cast %30 : vector<1x4x256xf32> to vector<4x256xf32>
    %32 = vector.shape_cast %29 : vector<4x256xf32> to vector<1x4x256xf32>
    tpu.vector_store %arg5[%c0_6, %c0_7, %c0_8], %32 {strides = array<i32>} : memref<1x4x256xf32, #tpu.memory_space<vmem>>, vector<1x4x256xf32>,
    return
  }
  func.func @transform_0(%arg0: i32, %arg1: i32) -> (i32, i32, i32) {
    %c0_i32 = arith.constant 0 : i32
    %c0_i32_0 = arith.constant 0 : i32
    return %arg0, %c0_i32, %arg1 : i32, i32, i32
  }
  func.func @transform_1(%arg0: i32, %arg1: i32) -> (i32, i32) {
    %c0_i32 = arith.constant 0 : i32
    %c0_i32_0 = arith.constant 0 : i32
    %c0_i32_1 = arith.constant 0 : i32
    return %c0_i32, %c0_i32_0 : i32, i32
  }
  func.func @transform_2(%arg0: i32, %arg1: i32) -> (i32, i32) {
    %c0_i32 = arith.constant 0 : i32
    %c0_i32_0 = arith.constant 0 : i32
    %c0_i32_1 = arith.constant 0 : i32
    return %c0_i32, %c0_i32_0 : i32, i32
  }
  func.func @transform_3(%arg0: i32, %arg1: i32) -> (i32, i32, i32) {
    %c0_i32 = arith.constant 0 : i32
    %c0_i32_0 = arith.constant 0 : i32
    return %arg0, %c0_i32, %arg1 : i32, i32, i32
  }
}

</mosaic_0001>

<bundles_post_ra>
// kernel: tpu_custom_call.1
= control target key start
LH: loop header
LB: loop body
LE: loop exit
PB: predicated region body
PF: predicated region fallthrough
CT: control target
= control target key end

     0   :  { %8 = vsyncpa [#allocation3], 0  ;;  %s841_s0 = inlined_call_operand.hbm [shape: f32[2,4,256], index: 0, kind: input, shape index: {}]   ;;  %s842_s1 = inlined_call_operand.vmem [shape: f32[4,4], index: 1, kind: input, shape index: {}]   ;;  %s843_s2 = inlined_call_operand.vmem [shape: f32[4,1], index: 2, kind: input, shape index: {}]   ;;  %s844_s3 = inlined_call_operand.hbm [shape: f32[2,4,256], index: 3, kind: output, shape index: {}]  }
   0x1   :  { %10 = vsyncpa [#allocation3 + $0x1], 0 }
   0x2   :  { %11 = vsyncpa [#allocation4], 0 }
   0x3   :  { %13 = vsyncpa [#allocation4 + $0x1], 0  ;;  %s659_s12 = smov 0   ;;  %s661_s13 = smov 0  }
   0x4   :  { %s663_s14 = smov 0   ;;  %s665_s15 = smov 0  }
   0x5   :  { %s667_s16 = smov 0   ;;  %s669_s17 = smov 0  }
   0x6 LB: > { %s431_s18 = sadd.s32 4294967295, %s631_s17   ;;  %s432_s19 = sadd.s32 4294967294, %s631_s17   ;;  %s631_s17 = sphi %s669_s17, %s19_s17   ;;  %s627_s16 = sphi %s667_s16, %s860_s16   ;;  %s623_s15 = sphi %s665_s15, %s859_s15   ;;  %s619_s14 = sphi %s663_s14, %s858_s14   ;;  %s615_s13 = sphi %s661_s13, %s857_s13   ;;  %s611_s12 = sphi %s659_s12, %s856_s12  }
   0x7   : > { %s31_s20 = sadd.s32 1, %s627_s16  ;;  %s40_s21 = sadd.s32 1, %s619_s14 }
   0x8   : > { %p33_p0 = scmp.ge.s32.totalorder %s31_s20, 2  ;;  %p47_p1 = scmp.ne.s32.totalorder %s619_s14, %s615_s13 }
   0x9   : > { %p48_p2 = scmp.eq.s32.totalorder %s631_s17, 0  ;;  %p53_p3 = scmp.ne.s32.totalorder %s615_s13, %s611_s12 }
   0xa   : > { %s862_s20 = smov (%p33_p0, %s31_s20), 0  ;;  %p54_p5 = scmp.eq.s32.totalorder %s431_s18, 0 }
   0xb   : > { %p700_p4 = por %p48_p2, %p47_p1  ;;  %s35_s23 = ssub.s32 %s627_s16, %s862_s20 }
   0xc   : > { %p121_p6 = scmp.eq.s32.totalorder %s431_s18, 1  ;;  %p38_p7 = scmp.eq.s32.totalorder %s35_s23, 0 }
   0xd   : > { %p706_p8 = por %p54_p5, %p53_p3  ;;  %p127_p10 = scmp.eq.s32.totalorder %s432_s19, 1 }
   0xe   : > { %p710_p9 = por %p121_p6, %p47_p1  ;;  %p460_p13 = scmp.lt.s32.totalorder %s631_s17, 2 }
   0xf   : > { %s715_s26 = scalar_select %p38_p7, %s619_s14, %s40_s21  }
  0x10   : > { %s848_s25 = scalar_select %p710_p9, 1, 0 }
  0x11   : > { %p717_p11 = por %p127_p10, %p53_p3  ;;  %s153_s28 = sand.u32 1, %s619_s14  }
  0x12   : > { %s435_s29 = sshll.u32 %s153_s28, 3  ;;  %s446_s30 = sshll.u32 %s627_s16, 7 }
  0x13   : > { %s849_s27 = scalar_select %p717_p11, 1, 0 }
  0x14   : > { %s728_s6 = scalar_lea.hbm %s841_s0, %s446_s30  ;;  %s157_s7 = scalar_lea.vmem [#allocation2], %s435_s29 }
  0x15   : > { %s167_s8 = sshll.u32 %s157_s7, 4  ;;  %p734_p0 = pnand %p460_p13, %p700_p4  ;;  %s730_s8 = int_to_ptr.vmem [resolvable:$true] %s167_s8 }
  0x16   : > { %s154_s10 = scalar_lea.sflag [#allocation3], %s153_s28  ;;  %s519_s11 = scalar_lea.hbm %s728_s6, 128 }
  0x17   : > { %p520_p3 = scmp.ne.s32.totalorder %s728_s6, %s519_s11  ;;  %p521_p5 = pneg %p734_p0 }
  0x18   : > { %s524_s21 = scalar_lea.hbm %s841_s0, 256  ;;  %p525_p4 = scmp.lt.u32.totalorder %s728_s6, %s841_s0 }
  0x19   : > { %p522_p6 = pnand %p521_p5, %p520_p3  ;;  %p526_p10 = scmp.lt.u32.totalorder %s524_s21, %s519_s11 }
  0x1a   : > { %p528_p12 = scmp.lt.u32.totalorder %s519_s11, %s728_s6 }
  0x1b   : > { %p523_p7 = pneg %p522_p6  ;;  %p527_p13 = por %p526_p10, %p525_p4 }
  0x1d   : > { %p529_p1 = por %p528_p12, %p527_p13 }
  0x1f   : > { %p530_p2 = pnand %p529_p1, %p523_p7 }
  0x21   : > { %533 = shalt.err (!%p530_p2)
}
  0x22   : > { %s534_s28 = scalar_lea.vmem %s730_s8, 128  ;;  %s633_s29 = smov [#allocation2]  }
  0x23   : > { %p535_p3 = scmp.ne.s32.totalorder %s730_s8, %s534_s28  ;;  %s539_s30 = sshll.u32 %s633_s29, 4  ;;  %s540_s30 = int_to_ptr.vmem [resolvable:$false] %s539_s30 }
  0x24   : > { %s541_s4 = scalar_lea.vmem %s540_s30, 256  ;;  %p542_p9 = scmp.lt.s32.totalorder %s730_s8, %s540_s30 }
  0x25   : > { %p537_p6 = pnand %p535_p3, %p521_p5  ;;  %p543_p4 = scmp.lt.s32.totalorder %s541_s4, %s534_s28 }
  0x27   : > { %p538_p11 = pneg %p537_p6  ;;  %p544_p10 = por %p543_p4, %p542_p9 }
  0x29   : > { %p545_p12 = pnand %p544_p10, %p538_p11 }
  0x2b   : > { %548 = shalt.err (!%p545_p12)
}
  0x2c   : > { %455 = dma.hbm_to_vmem [thread:$0]  (!%p734_p0), %s728_s6, 128, %s730_s8, %s154_s10  }
  0x2d   : > { %p851_p1 = scmp.lt.s32.totalorder %s631_s17, 3  ;;  %p852_p2 = scmp.ge.s32.totalorder %s631_s17, 1 }
  0x2f   : > { %p173_p5 = pnand %p852_p2, %p851_p1 }
  0x30   : > { %s770_s5 = sand.u32 (!%p173_p5), 1, %s615_s13  }
  0x31   : > { %176 = sbr.rel (%p173_p5) target bundleno = 217 (0xd9), region = 32  ;;  %s439_s7 = sshll.u32 (!%p173_p5), %s770_s5, 3 }
  0x32   : > { %s179_s11 = scalar_lea.sflag (!%p173_p5), [#allocation3], %s770_s5  ;;  %s182_s9 = scalar_lea.vmem (!%p173_p5), [#allocation2], %s439_s7 }
  0x38   : > { %602 = dma.done.wait (%p706_p8), %s179_s11, 128  }
  0x39   : > { %604 = vsyncadd (%p706_p8), %s179_s11, 4294967168  ;;  %v634_v0 = vmov 0   ;;  %v635_v1 = vmov 1   ;;  %v209_v2 = vld [vmem:[%s843_s2] sm:$0xf]  ;;  %v636_v4 = vmov 2   ;;  %v225_v6 = vlaneseq }
  0x3a   : > { %514 = vset.pattern.permute.xlu0 %v634_v0  ;;  %515 = vset.pattern.permute.xlu1 %v635_v1  ;;  %v208_v3 = vld [vmem:[%s842_s1] sm:$0xf]  ;;  %v637_v5 = vmov 3   ;;  %s447_s24 = sshll.u32 %s623_s15, 7  ;;  %s204_s19 = scalar_lea.vmem [#allocation5], %s439_s7 }
  0x3b   : > { %212 = vperm.xlu0 %514, %v209_v2   ;;  %248 = vperm.xlu1 %515, %v208_v3   ;;  %v226_v7 = vshrl.u32 %v225_v6, 7  ;;  %v207_v12 = vld [vmem:[%s182_s9] sm:$0xff]  ;;  %s347_s21 = sshll.u32 %s204_s19, 4  ;;  %s792_s28 = scalar_lea.hbm %s844_s3, %s447_s24  ;;  %s794_s21 = int_to_ptr.vmem [resolvable:$true] %s347_s21 }
  0x3c   : > { %v216_v25 = vcombine.high %v207_v12, %v207_v12  ;;  %s331_s29 = scalar_lea.sflag [#allocation4], %s770_s5  ;;  %s549_s30 = scalar_lea.vmem %s794_s21, 128 }
  0x3d   : > { %v227_v8 = vsub.s32 0, %v226_v7  ;;  %v231_v9 = vsub.s32 4, %v226_v7  ;;  %v253_v10 = vsub.s32 1, %v226_v7  ;;  %v257_v11 = vsub.s32 5, %v226_v7  ;;  %p550_p8 = scmp.ne.s32.totalorder %s794_s21, %s549_s30  ;;  %p853_p9 = scmp.ne.s32.totalorder %s848_s25, 0 }
  0x3e   : > { %v279_v13 = vsub.s32 2, %v226_v7  ;;  %v283_v14 = vsub.s32 6, %v226_v7  ;;  %v305_v19 = vsub.s32 3, %v226_v7  ;;  %v309_v20 = vsub.s32 7, %v226_v7  ;;  %s638_s15 = smov [#allocation5]  }
  0x3f   : > { %222 = vperm.xlu0 %514, %v208_v3   ;;  %516 = vset.pattern.permute.xlu1 %v636_v4  ;;  %v228_v15 = vrot.slane %v207_v12, %v227_v8  ;;  %v232_v16 = vrot.slane %v207_v12, %v231_v9  ;;  %v254_v17 = vrot.slane %v207_v12, %v253_v10  ;;  %p551_p11 = pnand %p550_p8, %p853_p9  ;;  %s553_s4 = sshll.u32 %s638_s15, 4  ;;  %s554_s4 = int_to_ptr.vmem [resolvable:$false] %s553_s4 }
  0x40   : > { %274 = vperm.xlu1 %516, %v208_v3   ;;  %v258_v18 = vrot.slane %v207_v12, %v257_v11  ;;  %v280_v21 = vrot.slane %v207_v12, %v279_v13  ;;  %v284_v22 = vrot.slane %v207_v12, %v283_v14  ;;  %v306_v30 = vrot.slane %v207_v12, %v305_v19  ;;  %s555_s7 = scalar_lea.vmem %s554_s4, 256  ;;  %p556_p7 = scmp.lt.s32.totalorder %s794_s21, %s554_s4 }
  0x41   : > { %v238_v26 = vrot.slane %v228_v15, %v227_v8  ;;  %v242_v27 = vrot.slane %v232_v16, %v227_v8  ;;  %v264_v28 = vrot.slane %v254_v17, %v253_v10  ;;  %v310_v31 = vrot.slane %v207_v12, %v309_v20  ;;  %p552_p0 = pneg %p551_p11  ;;  %p557_p13 = scmp.lt.s32.totalorder %s555_s7, %s549_s30 }
  0x42   : > { %v268_v29 = vrot.slane %v258_v18, %v253_v10  ;;  %v290_v32 = vrot.slane %v280_v21, %v279_v13  ;;  %v294_v33 = vrot.slane %v284_v22, %v279_v13  ;;  %v316_v42 = vrot.slane %v306_v30, %v305_v19 }
  0x43   : > { %517 = vset.pattern.permute.xlu0 %v637_v5  ;;  %v320_v43 = vrot.slane %v310_v31, %v305_v19  ;;  %p558_p3 = por %p557_p13, %p556_p7 }
  0x44   : > { %300 = vperm.xlu0 %517, %v208_v3  }
  0x45   : > { %p559_p6 = pnand %p558_p3, %p552_p0 }
  0xba   : > { %v213_v23 = vpop.permute.xlu0 %212  ;;  %v249_v24 = vpop.permute.xlu1 %248 }
  0xbb   : > { %v218_v35 = vadd.f32 %v213_v23, %v207_v12  ;;  %v219_v36 = vadd.f32 %v216_v25, %v213_v23  ;;  %v269_v40 = vmul.f32 %v264_v28, %v249_v24  ;;  %v270_v41 = vmul.f32 %v268_v29, %v249_v24 }
  0xbe   : > { %v223_v34 = vpop.permute.xlu0 %222 }
  0xbf   : > { %v243_v37 = vmul.f32 %v238_v26, %v223_v34  ;;  %v244_v38 = vmul.f32 %v242_v27, %v223_v34  ;;  %v275_v39 = vpop.permute.xlu1 %274 }
  0xc0   : > { %v295_v46 = vmul.f32 %v290_v32, %v275_v39  ;;  %v296_v47 = vmul.f32 %v294_v33, %v275_v39 }
  0xc1   : > { %v245_v44 = vadd.f32 %v243_v37, %v218_v35  ;;  %v246_v45 = vadd.f32 %v244_v38, %v219_v36 }
  0xc3   : > { %v271_v48 = vadd.f32 %v269_v40, %v245_v44  ;;  %v272_v49 = vadd.f32 %v270_v41, %v246_v45  ;;  %v301_v50 = vpop.permute.xlu0 %300 }
  0xc4   : > { %v321_v51 = vmul.f32 %v316_v42, %v301_v50  ;;  %v322_v52 = vmul.f32 %v320_v43, %v301_v50 }
  0xc5   : > { %v297_v53 = vadd.f32 %v295_v46, %v271_v48  ;;  %v298_v54 = vadd.f32 %v296_v47, %v272_v49 }
  0xc7   : > { %v323_v55 = vadd.f32 %v321_v51, %v297_v53  ;;  %v324_v56 = vadd.f32 %v322_v52, %v298_v54 }
  0xc9   : > { %v327_v57 = vcombine.low %v323_v55, %v324_v56 }
  0xcb   : > { %329 = vst [vmem:[%s204_s19] sm:$0xff] %v327_v57 }
  0xcc   : > { %562 = shalt.err (!%p559_p6)
}
  0xcd   : > { %s563_s5 = scalar_lea.hbm %s792_s28, 128  ;;  %s567_s6 = scalar_lea.hbm %s844_s3, 256 }
  0xce   : > { %p564_p4 = scmp.ne.s32.totalorder %s792_s28, %s563_s5  ;;  %p568_p1 = scmp.lt.u32.totalorder %s792_s28, %s844_s3 }
  0xcf   : > { %p569_p2 = scmp.lt.u32.totalorder %s567_s6, %s563_s5  ;;  %p571_p8 = scmp.lt.u32.totalorder %s563_s5, %s792_s28 }
  0xd0   : > { %p565_p10 = pnand %p564_p4, %p853_p9 }
  0xd1   : > { %p570_p5 = por %p569_p2, %p568_p1 }
  0xd2   : > { %p566_p12 = pneg %p565_p10 }
  0xd3   : > { %p572_p11 = por %p571_p8, %p570_p5 }
  0xd5   : > { %p573_p0 = pnand %p572_p11, %p566_p12 }
  0xd7   : > { %576 = shalt.err (!%p573_p0)
}
  0xd8   : > { %450 = dma.vmem_to_hbm [thread:$0]  (%p853_p9), %s794_s21, 128, %s792_s28, %s331_s29  }
  0xd9 PF: > { %s359_s18 = sand.u32 1, %s611_s12   ;;  %p854_p7 = scmp.ne.s32.totalorder %s849_s27, 0 }
  0xda   : > { %p855_p13 = scmp.ge.s32.totalorder %s631_s17, 2  ;;  %s360_s24 = scalar_lea.sflag [#allocation4], %s359_s18 }
  0xdc   : > { %p457_p3 = pnand %p855_p13, %p854_p7 }
  0xde   : > { %606 = dma.done.wait (!%p457_p3), %s360_s24, 128  }
  0xdf   : > { %608 = vsyncadd (!%p457_p3), %s360_s24, 4294967168  ;;  %s19_s17 = sadd.s32 1, %s631_s17   ;;  %s856_s12 = smov %s615_s13 }
  0xe0   : > { %p16_p6 = scmp.ge.s32.totalorder %s19_s17, 4   ;;  %s857_s13 = smov %s619_s14 }
  0xe1   : > { %s858_s14 = smov %s715_s26  ;;  %s859_s15 = smov %s627_s16 }
  0xe2   : > { %s860_s16 = smov %s862_s20  ;;  %18 = sbr.rel (!%p16_p6) target bundleno = 6 (0x6), region = 77 }
  0xe9   :  { %365 = vsyncpa [#allocation3], 1 }
  0xea   :  { %367 = vsyncpa [#allocation3 + $0x1], 1 }
  0xeb   :  { %368 = vsyncpa [#allocation4], 1 }
  0xec   :  { %370 = vsyncpa [#allocation4 + $0x1], 1 }

</bundles_post_ra>
